<compile_context>
chip_gen: v7x
topology: tpu7x:2x2x1
jax: 0.10.0
libtpu: 0.0.40
codegen_flags: <defaults>
</compile_context>

<pallas_src>
import functools

import jax
import jax.numpy as jnp
from jax.experimental import pallas as pl
from jax.experimental.pallas import tpu as pltpu


def _round_up(v, m):
    return ((v + m - 1) // m) * m


def _mlp_kernel(x_ref, p_ref, w2_ref, o_ref, *, chunk, num_chunks, unroll):
    # x_ref:  (1, TN)  batch in lanes          o_ref: (1, TN)
    # p_ref:  (20, 8)  packed [w1 | b1 | b2 | w3 | b3@row0 | pad]
    # w2_ref: (20, 20) PyTorch (out, in) layout
    # Hoist all parameter loads out of the chunk loop (they stay in vregs).
    w1 = p_ref[:, 0:1]          # (20, 1)
    b1 = p_ref[:, 1:2]          # (20, 1)
    b2 = p_ref[:, 2:3]          # (20, 1)
    w3 = p_ref[:, 3:4]          # (20, 1)
    b3 = p_ref[0:1, 4:5]        # (1, 1)
    w2 = w2_ref[...]            # (20, 20)

    def body(c, carry):
        start = pl.multiple_of(c * chunk, chunk)
        xb = x_ref[:, pl.ds(start, chunk)]                        # (1, chunk)
        # Layer 1: Linear(1, 20) == outer product -> pure VPU broadcast FMA.
        h1 = jnp.maximum(w1 * xb + b1, 0.0)                       # (20, chunk)
        # Layer 2: the only real matmul; batch feeds the MXU N dimension.
        h2 = jnp.dot(w2, h1, preferred_element_type=jnp.float32) + b2
        h2 = jnp.maximum(h2, 0.0)                                 # (20, chunk)
        # Layer 3: Linear(20, 1) == per-column dot -> multiply + sublane reduce.
        out = jnp.sum(w3 * h2, axis=0, keepdims=True) + b3        # (1, chunk)
        o_ref[:, pl.ds(start, chunk)] = out.astype(o_ref.dtype)
        return carry

    # Vreg-resident sub-chunk loop: intermediates live for one chunk only,
    # so nothing spills to VMEM even with very large lane tiles.
    jax.lax.fori_loop(0, num_chunks, body, 0, unroll=unroll)


@functools.partial(jax.jit, static_argnames=("block_n",))
def sine_approximator_forward(x, params, *, block_n=32768):
    """x: (N, 1) float32. params: PyTorch-layout (out, in) weights/biases."""
    n = x.shape[0]

    # ---- grid / tile sizing (all static under jit) ------------------------
    block_n = _round_up(max(block_n, 128), 128)       # lane tile must be /128
    n_lanes = _round_up(n, 128)                       # batch -> full 128-lane vregs
    tn = min(block_n, n_lanes)
    # v7x has 2 TensorCores: the "parallel" batch axis only helps with >= 2
    # grid steps, so split a single-tile batch in two once it is big enough
    # that the extra ~0.35us step is noise on 1-TC chips (v5e/v6e).
    if tn >= n_lanes and n_lanes >= 1024:
        tn = _round_up(n_lanes // 2, 128)
    n_pad = _round_up(n_lanes, tn)
    grid = (n_pad // tn,)

    # Inner sub-chunk: 512 lanes keeps the (20, chunk) f32 intermediates at
    # ~25-30 vregs (< 64-entry vreg file); fall back so that chunk | tn.
    chunk = 512 if tn % 512 == 0 else (256 if tn % 256 == 0 else 128)
    num_chunks = tn // chunk
    unroll = num_chunks if num_chunks <= 16 else 8

    # Explicit VMEM budget: double-buffered x + out windows (padded to 8
    # sublanes) + params + headroom. Fits v5e/v6e (128 MiB) and v7x (64 MiB).
    vmem_limit = int(min(max(4 * (8 * tn * 4) + 8 * 1024 * 1024,
                             16 * 1024 * 1024),
                         56 * 1024 * 1024))

    # ---- wrapper-side layout plumbing (batch -> lanes) ---------------------
    x_t = jnp.pad(x.T, ((0, 0), (0, n_pad - n)))       # (1, n_pad)

    w2 = params["w2"].astype(jnp.float32)              # (20, 20) (out, in)
    # Pack the five tiny vectors into one (20, 8) slab -> one DMA / one VMEM
    # window per grid step instead of five sub-(8,128) transfers.
    pvec = jnp.concatenate(
        [params["w1"].reshape(20, 1),
         params["b1"].reshape(20, 1),
         params["b2"].reshape(20, 1),
         params["w3"].reshape(1, 20).T,
         jnp.pad(params["b3"].reshape(1, 1), ((0, 19), (0, 0))),
         jnp.zeros((20, 3), jnp.float32)], axis=1).astype(jnp.float32)

    const_spec = lambda shape: pl.BlockSpec(shape, lambda i: (0, 0))

    kernel = functools.partial(_mlp_kernel, chunk=chunk,
                               num_chunks=num_chunks, unroll=unroll)

    out_t = pl.pallas_call(
        kernel,
        out_shape=jax.ShapeDtypeStruct((1, n_pad), jnp.float32),
        grid=grid,
        in_specs=[
            pl.BlockSpec((1, tn), lambda i: (0, i)),    # x (lane-dense tiles)
            const_spec((20, 8)),                        # packed small params
            const_spec((20, 20)),                       # w2
        ],
        out_specs=pl.BlockSpec((1, tn), lambda i: (0, i)),
        compiler_params=pltpu.CompilerParams(
            dimension_semantics=("parallel",),          # 2 TCs on v7x
            vmem_limit_bytes=vmem_limit,
        ),
    )(x_t, pvec, w2)

    # Padded tail lanes hold relu(b1)-derived garbage; sliced off here.
    return out_t[:, :n].T                               # back to (N, 1)


def init_params(key):
    """Deterministic init matching PyTorch nn.Linear layout (out, in)."""
    k1, k2, k3, k4, k5, k6 = jax.random.split(key, 6)

    def uniform_linear(kw, kb, fan_in, fan_out):
        # PyTorch default: U(-1/sqrt(fan_in), 1/sqrt(fan_in))
        bound = 1.0 / jnp.sqrt(jnp.float32(fan_in))
        w = jax.random.uniform(kw, (fan_out, fan_in), jnp.float32,
                               minval=-bound, maxval=bound)
        b = jax.random.uniform(kb, (fan_out,), jnp.float32,
                               minval=-bound, maxval=bound)
        return w, b

    w1, b1 = uniform_linear(k1, k2, 1, 20)
    w2, b2 = uniform_linear(k3, k4, 20, 20)
    w3, b3 = uniform_linear(k5, k6, 20, 1)
    return {"w1": w1, "b1": b1, "w2": w2, "b2": b2, "w3": w3, "b3": b3}


def reference_forward(x, p):
    h1 = jnp.maximum(x @ p["w1"].T + p["b1"], 0.0)
    h2 = jnp.maximum(h1 @ p["w2"].T + p["b2"], 0.0)
    return h2 @ p["w3"].T + p["b3"]


if __name__ == "__main__":
    key = jax.random.PRNGKey(0)
    kx, kp = jax.random.split(key)
    params = init_params(kp)

    # batch=8 -> single chunk; batch=300 -> multi-chunk inner loop + padding.
    for batch in (8, 300):
        kx, kb = jax.random.split(kx)
        x = jax.random.uniform(kb, (batch, 1), jnp.float32,
                               minval=-jnp.pi, maxval=jnp.pi)

        out = jax.block_until_ready(sine_approximator_forward(x, params))
        ref = reference_forward(x, params)

        assert out.shape == (batch, 1)
        assert jnp.allclose(out, ref, atol=1e-5, rtol=1e-5), (
            f"mismatch at batch={batch}: "
            f"max abs err = {jnp.max(jnp.abs(out - ref))}")

    print("KERNEL_OK")
</pallas_src>

<mosaic_0001>
module attributes {stable_mosaic.version = 11 : i64} {
  func.func @_mlp_kernel(%arg0: i32, %arg1: memref<1x128xf32, #tpu.memory_space<vmem>>, %arg2: memref<20x8xf32, #tpu.memory_space<vmem>>, %arg3: memref<20x20xf32, #tpu.memory_space<vmem>>, %arg4: memref<1x128xf32, #tpu.memory_space<vmem>>) attributes {dimension_semantics = [#tpu.dimension_semantics<parallel>], iteration_bounds = array<i64: 1>, scalar_prefetch = 0 : i64, scratch_operands = 0 : i64, tpu.core_type = #tpu.core_type<tc>, window_params = [{transform_indices = @transform_0, window_bounds = array<i64: 1, 128>}, {pipeline_mode = #tpu.pipeline_mode<synchronous>, transform_indices = @transform_1, window_bounds = array<i64: 20, 8>}, {pipeline_mode = #tpu.pipeline_mode<synchronous>, transform_indices = @transform_2, window_bounds = array<i64: 20, 20>}, {transform_indices = @transform_3, window_bounds = array<i64: 1, 128>}]} {
    %c0 = arith.constant 0 : index
    %c0_0 = arith.constant 0 : index
    %0 = vector.load %arg2[%c0, %c0_0] : memref<20x8xf32, #tpu.memory_space<vmem>>, vector<20x1xf32>
    %c0_1 = arith.constant 0 : index
    %c1 = arith.constant 1 : index
    %1 = vector.load %arg2[%c0_1, %c1] : memref<20x8xf32, #tpu.memory_space<vmem>>, vector<20x1xf32>
    %c0_2 = arith.constant 0 : index
    %c2 = arith.constant 2 : index
    %2 = vector.load %arg2[%c0_2, %c2] : memref<20x8xf32, #tpu.memory_space<vmem>>, vector<20x1xf32>
    %c0_3 = arith.constant 0 : index
    %c3 = arith.constant 3 : index
    %3 = vector.load %arg2[%c0_3, %c3] : memref<20x8xf32, #tpu.memory_space<vmem>>, vector<20x1xf32>
    %c0_4 = arith.constant 0 : index
    %c4 = arith.constant 4 : index
    %4 = vector.load %arg2[%c0_4, %c4] : memref<20x8xf32, #tpu.memory_space<vmem>>, vector<1x1xf32>
    %c0_5 = arith.constant 0 : index
    %c0_6 = arith.constant 0 : index
    %5 = vector.load %arg3[%c0_5, %c0_6] : memref<20x20xf32, #tpu.memory_space<vmem>>, vector<20x20xf32>
    %c0_i32 = arith.constant 0 : i32
    %c128_i32 = arith.constant 128 : i32
    %6 = arith.muli %c0_i32, %c128_i32 : i32
    %7 = tpu.assume_multiple %6, 128 : i32
    %c0_7 = arith.constant 0 : index
    %8 = arith.index_cast %7 : i32 to index
    %9 = vector.load %arg1[%c0_7, %8] : memref<1x128xf32, #tpu.memory_space<vmem>>, vector<1x128xf32>
    %10 = vector.broadcast %0 : vector<20x1xf32> to vector<20x128xf32>
    %11 = vector.broadcast %9 : vector<1x128xf32> to vector<20x128xf32>
    %12 = arith.mulf %10, %11 : vector<20x128xf32>
    %13 = vector.broadcast %1 : vector<20x1xf32> to vector<20x128xf32>
    %14 = arith.addf %12, %13 : vector<20x128xf32>
    %cst = arith.constant 0.000000e+00 : f32
    %15 = vector.broadcast %cst : f32 to vector<20x128xf32>
    %16 = arith.maximumf %14, %15 : vector<20x128xf32>
    %cst_8 = arith.constant dense<0.000000e+00> : vector<20x128xf32>
    %17 = tpu.matmul %5, %16, %cst_8 {dimension_numbers = #tpu.dot_dimension_numbers<[1], [0], [0], [1], [0, 0, 1, 1], [], []>} : vector<20x20xf32>, vector<20x128xf32>, vector<20x128xf32> -> vector<20x128xf32>
    %18 = vector.broadcast %2 : vector<20x1xf32> to vector<20x128xf32>
    %19 = arith.addf %17, %18 : vector<20x128xf32>
    %cst_9 = arith.constant 0.000000e+00 : f32
    %20 = vector.broadcast %cst_9 : f32 to vector<20x128xf32>
    %21 = arith.maximumf %19, %20 : vector<20x128xf32>
    %22 = vector.broadcast %3 : vector<20x1xf32> to vector<20x128xf32>
    %23 = arith.mulf %22, %21 : vector<20x128xf32>
    %cst_10 = arith.constant dense<0.000000e+00> : vector<128xf32>
    %24 = vector.multi_reduction <add>, %23, %cst_10 [0] : vector<20x128xf32> to vector<128xf32>
    %25 = vector.shape_cast %24 : vector<128xf32> to vector<1x128xf32>
    %26 = vector.broadcast %4 : vector<1x1xf32> to vector<1x128xf32>
    %27 = arith.addf %25, %26 : vector<1x128xf32>
    %c0_11 = arith.constant 0 : index
    %28 = arith.index_cast %7 : i32 to index
    %29 = vector.load %arg4[%c0_11, %28] : memref<1x128xf32, #tpu.memory_space<vmem>>, vector<1x128xf32>
    tpu.vector_store %arg4[%c0_11, %28], %27 {strides = array<i32>} : memref<1x128xf32, #tpu.memory_space<vmem>>, vector<1x128xf32>,
    %c1_i32 = arith.constant 1 : i32
    return
  }
  func.func @transform_0(%arg0: i32) -> (i32, i32) {
    %c0_i32 = arith.constant 0 : i32
    %c0_i32_0 = arith.constant 0 : i32
    return %c0_i32, %arg0 : i32, i32
  }
  func.func @transform_1(%arg0: i32) -> (i32, i32) {
    %c0_i32 = arith.constant 0 : i32
    %c0_i32_0 = arith.constant 0 : i32
    %c0_i32_1 = arith.constant 0 : i32
    return %c0_i32, %c0_i32_0 : i32, i32
  }
  func.func @transform_2(%arg0: i32) -> (i32, i32) {
    %c0_i32 = arith.constant 0 : i32
    %c0_i32_0 = arith.constant 0 : i32
    %c0_i32_1 = arith.constant 0 : i32
    return %c0_i32, %c0_i32_0 : i32, i32
  }
  func.func @transform_3(%arg0: i32) -> (i32, i32) {
    %c0_i32 = arith.constant 0 : i32
    %c0_i32_0 = arith.constant 0 : i32
    return %c0_i32, %arg0 : i32, i32
  }
}

</mosaic_0001>

<bundles_post_ra>
// kernel: sine_approximator_forward.1
= control target key start
LH: loop header
LB: loop body
LE: loop exit
PB: predicated region body
PF: predicated region fallthrough
CT: control target
= control target key end

     0   :  { %v256_v0 = vmov 1   ;;  %v257_v1 = vmov 0   ;;  %v258_v5 = vmov 0.0|0.0   ;;  %vm259_vm0 = vmmov 0   ;;  %s317_s1 = inlined_call_operand.vmem [shape: f32[20,8], index: 1, kind: input, shape index: {}]   ;;  %s318_s0 = inlined_call_operand.vmem [shape: f32[1,128], index: 0, kind: input, shape index: {}]   ;;  %s319_s2 = inlined_call_operand.vmem [shape: f32[20,20], index: 2, kind: input, shape index: {}]   ;;  %s320_s3 = inlined_call_operand.vmem [shape: f32[1,128], index: 3, kind: output, shape index: {}]  }
   0x1   :  { %250 = vset.pattern.permute.xlu1 %v256_v0  ;;  %249 = vset.pattern.permute.xlu0 %v257_v1  ;;  %v14_v2 = vld [vmem:[%s317_s1] sm:$0xff]  ;;  %v15_v3 = vld [vmem:[%s317_s1 + $0x8] sm:$0xff]  ;;  %v16_v4 = vld [vmem:[%s317_s1 + $0x10] sm:$0xf]  ;;  %v260_v6 = vmov 0.0   ;;  %v261_v7 = vmov 2  }
   0x2   :  { %47 = vperm.xlu1 %250, %v14_v2   ;;  %24 = vperm.xlu0 %249, %v14_v2   ;;  %v262_v8 = vmov 3   ;;  %v17_v9 = vld [vmem:[%s317_s1] sm:$0x1]  ;;  %v263_v10 = vmov 4   ;;  %vm86_vm1 = vcmask 1043456   ;;  %vm76_vm2 = vcmask 162816  }
   0x3   :  { %234 = vmatprep.subr.bf16.mxu0 %v258_v5  ;;  %237 = vmatprep.subr.bf16.mxu1 %v258_v5  ;;  %v208_v11 = vld [vmem:[%s318_s0] ss:$0 sm:$0xff]  ;;  %v19_v29 = vld [vmem:[%s319_s2 + $0x8] sm:$0xff]  ;;  %v20_v30 = vld [vmem:[%s319_s2 + $0x10] sm:$0xf] }
   0x4   :  { %225 = vmatprep.mubr.msk.f32.mxu0 %vm259_vm0, %v260_v6  ;;  %228 = vmatprep.mubr.msk.f32.mxu1 %vm259_vm0, %v260_v6  ;;  %v18_v28 = vld [vmem:[%s319_s2] sm:$0xff] }
   0x6   :  { %51 = vperm.xlu1 %250, %v15_v3   ;;  %29 = vperm.xlu0 %249, %v15_v3  }
   0xa   :  { %55 = vperm.xlu1 %250, %v16_v4   ;;  %34 = vperm.xlu0 %249, %v16_v4  }
   0xe   :  { %252 = vset.pattern.permute.xlu1 %v261_v7  ;;  %251 = vset.pattern.permute.xlu0 %v261_v7 }
   0xf   :  { %69 = vperm.xlu1 %252, %v15_v3   ;;  %65 = vperm.xlu0 %251, %v14_v2  }
  0x13   :  { %73 = vperm.xlu1 %252, %v16_v4   ;;  %253 = vset.pattern.permute.xlu0 %v262_v8 }
  0x14   :  { %174 = vperm.xlu0 %253, %v14_v2  }
  0x17   :  { %254 = vset.pattern.permute.xlu1 %v262_v8 }
  0x18   :  { %178 = vperm.xlu1 %254, %v15_v3   ;;  %255 = vset.pattern.permute.xlu0 %v263_v10 }
  0x19   :  { %199 = vperm.xlu0 %255, %v17_v9  }
  0x1c   :  { %182 = vperm.xlu1 %254, %v16_v4  }
  0x81   :  { %v48_v12 = vpop.permute.xlu1 %47  ;;  %v25_v13 = vpop.permute.xlu0 %24 }
  0x82   :  { %v43_v14 = vmul.f32 %v208_v11, %v25_v13 }
  0x84   :  { %v58_v17 = vadd.f32 %v48_v12, %v43_v14 }
  0x85   :  { %v52_v15 = vpop.permute.xlu1 %51  ;;  %v30_v16 = vpop.permute.xlu0 %29 }
  0x86   :  { %v44_v18 = vmul.f32 %v208_v11, %v30_v16  ;;  %v61_v21 = vmax.f32 %v58_v17, 0.0 }
  0x88   :  { %v59_v19 = vadd.f32 %v52_v15, %v44_v18 }
  0x89   :  { %v35_v20 = vpop.permute.xlu0 %34  ;;  %v56_v24 = vpop.permute.xlu1 %55 }
  0x8a   :  { %v62_v22 = vmax.f32 %v59_v19, 0.0  ;;  %v45_v23 = vmul.f32 %v208_v11, %v35_v20 }
  0x8c   :  { %v60_v25 = vadd.f32 %v56_v24, %v45_v23  ;;  %v235_v26 = vpack.c.bf16 %v62_v22, %v61_v21 }
  0x8e   :  { %236 = vmatpush3.bf16.msra.mxu0 %v235_v26  ;;  %239 = vmatpush3.bf16.msra.mxu1 %v235_v26  ;;  %v63_v27 = vmax.f32 %v60_v25, 0.0  ;;  %v70_v31 = vpop.permute.xlu1 %69  ;;  %v66_v33 = vpop.permute.xlu0 %65 }
  0x8f   :  { %223 = vmatprep.subr.mxu0 %v260_v6  ;;  %238 = vmatprep.subr.mxu1 %v260_v6 }
  0x92   :  { %224 = vmatpush3.msk.msra.mxu0 %vm86_vm1, %v63_v27  ;;  %240 = vmatpush3.msk.msra.mxu1 %vm86_vm1, %v63_v27  ;;  %v74_v32 = vpop.permute.xlu1 %73 }
  0x93   :  { %226 = vmatmul.mubr.msk.f32.vlgmr.msra.gmra.mrb[0].mxu0 %vm76_vm2, %v18_v28  ;;  %229 = vmatmul.mubr.msk.f32.vlgmr.msra.gmra.mrb[0].mxu1 %vm76_vm2, %v19_v29  ;;  %v175_v41 = vpop.permute.xlu0 %174 }
  0x94   :  { %231 = vmatprep.mubr.msk.f32.mxu1 %vm259_vm0, %v260_v6 }
  0x97   :  { %232 = vmatmul.mubr.msk.f32.gmra.mrb[2].mxu1 %vm76_vm2, %v20_v30  ;;  %v179_v40 = vpop.permute.xlu1 %178 }
  0x98   :  { %v200_v60 = vpop.permute.xlu0 %199 }
  0x9b   :  { %v183_v51 = vpop.permute.xlu1 %182 }
 0x166   :  { %v156_v34 = vpop.f32.mrb[0].mxu0  ;;  %v161_v35 = vpop.f32.mrb[0].mxu1 }
 0x167   :  { %v157_v36 = vadd.f32 %v156_v34, %v66_v33  ;;  %v162_v37 = vadd.f32 %v161_v35, %v70_v31  ;;  %v230_v38 = vpop.f32.mrb[1].mxu1  ;;  %v227_v39 = vpop.f32.mrb[1].mxu0 }
 0x169   :  { %v170_v42 = vmax.f32 %v157_v36, 0.0  ;;  %v171_v43 = vmax.f32 %v162_v37, 0.0 }
 0x16a   :  { %v166_v44 = vpop.f32.mrb[2].mxu1 }
 0x16b   :  { %v186_v45 = vmul.f32 %v179_v40, %v171_v43  ;;  %v185_v46 = vmul.f32 %v175_v41, %v170_v42  ;;  %v167_v47 = vadd.f32 %v166_v44, %v74_v32  ;;  %v233_v48 = vpop.f32.mrb[3].mxu1 }
 0x16d   :  { %v188_v49 = vadd.f32 %v186_v45, %v185_v46  ;;  %v172_v50 = vmax.f32 %v167_v47, 0.0 }
 0x16f   :  { %v187_v52 = vmul.f32 %v183_v51, %v172_v50 }
 0x171   :  { %v189_v53 = vsel %vm86_vm1, %v187_v52, 0.0 }
 0x172   :  { %v190_v54 = vadd.f32 %v189_v53, %v188_v49 }
 0x174   :  { %v191_v55 = vrot.slane %v190_v54, 4 }
 0x176   :  { %v192_v56 = vadd.f32 %v191_v55, %v190_v54 }
 0x178   :  { %v193_v57 = vrot.slane %v192_v56, 2 }
 0x17a   :  { %v194_v58 = vadd.f32 %v193_v57, %v192_v56 }
 0x17c   :  { %v195_v59 = vrot.slane %v194_v58, 1 }
 0x17e   :  { %v196_v61 = vadd.f32 %v195_v59, %v194_v58 }
 0x180   :  { %v202_v62 = vadd.f32 %v200_v60, %v196_v61 }
 0x182   :  { %203 = vst [vmem:[%s320_s3] sm:$0x1] %v202_v62 }

</bundles_post_ra>
